<compile_context>
chip_gen: v5e
topology: v5e:2x2
jax: 0.10.0
libtpu: 0.0.40
codegen_flags: <defaults>
</compile_context>

<pallas_src>
import functools
import math

import jax
import jax.numpy as jnp
from jax.experimental import pallas as pl
from jax.experimental.pallas import tpu as pltpu


def _round_up(v, m):
    return ((v + m - 1) // m) * m


def _choose_tile(dim, cap, align):
    """Largest `align`-multiple tile <= cap, preferring exact divisors of the
    padded dimension (so no extra padding / partial tiles are introduced)."""
    d = _round_up(dim, align)
    if d <= cap:
        return d
    t = (cap // align) * align
    while t >= align:
        if d % t == 0:
            return t
        t -= align
    return (cap // align) * align


def _pad2(a, rows, cols):
    r, c = a.shape
    if r == rows and c == cols:
        return a                      # skip the HBM copy when already aligned
    return jnp.pad(a, ((0, rows - r), (0, cols - c)))


# ----------------------------------------------------------------------------
# Kernels
# ----------------------------------------------------------------------------

def _sl_kernel_acc_into_out(x_ref, w_ref, b_ref, o_ref):
    """f32 output: accumulate directly into the resident output block."""
    k = pl.program_id(2)

    @pl.when(k == 0)
    def _():
        o_ref[...] = jnp.broadcast_to(b_ref[...], o_ref.shape)

    o_ref[...] += jnp.dot(x_ref[...], w_ref[...],
                          preferred_element_type=jnp.float32)


def _sl_kernel_scratch_acc(x_ref, w_ref, b_ref, o_ref, acc_ref):
    """Narrow output dtype: f32 scratch accumulator, cast on the last k step."""
    k = pl.program_id(2)

    @pl.when(k == 0)
    def _():
        acc_ref[...] = jnp.broadcast_to(b_ref[...], acc_ref.shape)

    acc_ref[...] += jnp.dot(x_ref[...], w_ref[...],
                            preferred_element_type=jnp.float32)

    @pl.when(k == pl.num_programs(2) - 1)
    def _():
        o_ref[...] = acc_ref[...].astype(o_ref.dtype)


# ----------------------------------------------------------------------------
# Jitted GEMM wrapper (compiled once per (shapes, tiles, dtype) combination)
# ----------------------------------------------------------------------------

@functools.partial(jax.jit,
                   static_argnames=("tile_b", "tile_n", "tile_k",
                                    "out_dtype", "direct_out", "vmem_limit"))
def _sparse_linear_matmul(x_p, w_p, b_p, *, tile_b, tile_n, tile_k,
                          out_dtype, direct_out, vmem_limit):
    Bp, Kp = x_p.shape
    Kp2, Np = w_p.shape
    assert Kp == Kp2
    out_dt = jnp.dtype(out_dtype)

    grid = (Bp // tile_b, Np // tile_n, Kp // tile_k)

    in_bytes = x_p.dtype.itemsize
    out_bytes = out_dt.itemsize
    # bytes_accessed includes the re-streaming factors: x is re-read per N
    # block, W per B block (with tile_b == Bp this factor is 1).
    cost = pl.CostEstimate(
        flops=2 * Bp * Kp * Np,
        transcendentals=0,
        bytes_accessed=(Bp * Kp * in_bytes * grid[1]
                        + Kp * Np * in_bytes * grid[0]
                        + Np * 4 * grid[0]
                        + Bp * Np * out_bytes),
    )

    kernel = _sl_kernel_acc_into_out if direct_out else _sl_kernel_scratch_acc
    scratch = [] if direct_out else [pltpu.VMEM((tile_b, tile_n), jnp.float32)]

    return pl.pallas_call(
        kernel,
        out_shape=jax.ShapeDtypeStruct((Bp, Np), out_dt),
        grid_spec=pltpu.PrefetchScalarGridSpec(
            num_scalar_prefetch=0,
            grid=grid,
            in_specs=[
                pl.BlockSpec((tile_b, tile_k), lambda i, j, k: (i, k)),  # x
                pl.BlockSpec((tile_k, tile_n), lambda i, j, k: (k, j)),  # masked W
                pl.BlockSpec((1, tile_n), lambda i, j, k: (0, j)),       # bias row
            ],
            out_specs=pl.BlockSpec((tile_b, tile_n), lambda i, j, k: (i, j)),
            scratch_shapes=scratch,
        ),
        compiler_params=pltpu.CompilerParams(
            dimension_semantics=("parallel", "parallel", "arbitrary"),
            vmem_limit_bytes=vmem_limit,
        ),
        cost_estimate=cost,
    )(x_p, w_p, b_p)


# ----------------------------------------------------------------------------
# Layer wrapper: mask-fold / transpose / cast / pad the weight ONCE.
# ----------------------------------------------------------------------------

class SparseLinearPallas:
    """y = x @ (weight * adj.T).T + bias with the masked weight cached."""

    _TILE_N_CAP = 512
    _TILE_K_CAP = 2048
    _TILE_B_CAP = 512
    _VMEM_CAP = 48 << 20          # v7x-safe (64 MiB physical per TensorCore)

    def __init__(self, weight, adj, bias=None, compute_dtype=None):
        out_f, in_f = weight.shape
        assert adj.shape == (in_f, out_f), "adj must be (in_features, out_features)"
        self.in_features = in_f
        self.out_features = out_f

        self.compute_dtype = (jnp.dtype(compute_dtype)
                              if compute_dtype is not None
                              else jnp.dtype(weight.dtype))
        # Sublane alignment for the batch tile: 8 rows for 4-byte operands,
        # 16 for bf16/fp16, 32 for 1-byte types (packed-layout friendly).
        self.sublane = max(8, 32 // max(self.compute_dtype.itemsize, 1))

        # Batch-independent N/K tile choice (prefer exact divisors -> no pad).
        self.tile_k = _choose_tile(in_f, self._TILE_K_CAP, 128)
        self.tile_n = _choose_tile(out_f, self._TILE_N_CAP, 128)
        self.Kp = _round_up(in_f, self.tile_k)
        self.Np = _round_up(out_f, self.tile_n)
        # Keep >=2 N blocks when possible so the "parallel" N axis can be
        # split across v7x's two TensorCores even when the B grid collapses.
        if self.Np // self.tile_n == 1 and self.Np >= 256 and self.Np % 256 == 0:
            self.tile_n = self.Np // 2

        # Fold the sparsity mask into the weight once, lay it out (in, out) so
        # the kernel contracts directly (no transpose in the hot loop), cast to
        # the compute dtype and pad to tile boundaries. Cached across calls.
        w_io = (jnp.asarray(weight) * jnp.asarray(adj).T).T.astype(self.compute_dtype)
        self.w_p = _pad2(w_io, self.Kp, self.Np)

        if bias is None:
            b_row = jnp.zeros((1, out_f), jnp.float32)
        else:
            b_row = jnp.asarray(bias, jnp.float32).reshape(1, out_f)
        self.b_p = _pad2(b_row, 1, self.Np)

    def __call__(self, x):
        B, in_f = x.shape
        assert in_f == self.in_features
        out_dtype = jnp.dtype(x.dtype)

        # Cover the whole (rounded-up) batch with one tile when it fits, so the
        # masked weight streams from HBM exactly once per forward call.
        tile_b = min(_round_up(B, self.sublane), self._TILE_B_CAP)
        Bp = _round_up(B, tile_b)

        x_c = x if x.dtype == self.compute_dtype else x.astype(self.compute_dtype)
        x_p = _pad2(x_c, Bp, self.Kp)

        direct_out = (out_dtype == jnp.dtype(jnp.float32))

        # Derive the VMEM budget from the actual double-buffered tile bytes.
        in_b = self.compute_dtype.itemsize
        need = (2 * (tile_b * self.tile_k + self.tile_k * self.tile_n) * in_b
                + 2 * tile_b * self.tile_n * out_dtype.itemsize
                + 2 * self.tile_n * 4)
        if not direct_out:
            need += tile_b * self.tile_n * 4
        vmem_limit = int(min(max(need + (4 << 20), 32 << 20), self._VMEM_CAP))

        out_p = _sparse_linear_matmul(
            x_p, self.w_p, self.b_p,
            tile_b=tile_b, tile_n=self.tile_n, tile_k=self.tile_k,
            out_dtype=out_dtype.name, direct_out=direct_out,
            vmem_limit=vmem_limit)

        if Bp != B or self.Np != self.out_features:
            out_p = out_p[:B, :self.out_features]
        return out_p


def sparse_linear(x, weight, adj, bias, *, compute_dtype=None):
    """One-shot convenience wrapper (prefer SparseLinearPallas for caching)."""
    return SparseLinearPallas(weight, adj, bias, compute_dtype=compute_dtype)(x)


# ----------------------------------------------------------------------------
# Deterministic init mirroring the PyTorch module, plus a self-check.
# ----------------------------------------------------------------------------

def _init_params(key, in_features, out_features, sparsity=0.5):
    k_adj, k_w, k_b, k_x = jax.random.split(key, 4)

    # adj: (in, out) random 0/1 mask
    adj = (jax.random.uniform(k_adj, (in_features, out_features)) > sparsity
           ).astype(jnp.float32)

    # weight: kaiming_uniform_(a=sqrt(5)) on shape (out, in) -> U(-bound, bound)
    fan_in = in_features
    gain = math.sqrt(2.0 / (1.0 + 5.0))
    w_bound = gain * math.sqrt(3.0 / fan_in)
    weight = jax.random.uniform(k_w, (out_features, in_features),
                                minval=-w_bound, maxval=w_bound,
                                dtype=jnp.float32)

    # bias: U(-1/sqrt(fan_in), 1/sqrt(fan_in))
    b_bound = 1.0 / math.sqrt(fan_in)
    bias = jax.random.uniform(k_b, (out_features,),
                              minval=-b_bound, maxval=b_bound,
                              dtype=jnp.float32)
    return adj, weight, bias, k_x


if __name__ == "__main__":
    B, IN_F, OUT_F = 8, 32, 16

    key = jax.random.PRNGKey(0)
    adj, weight, bias, k_x = _init_params(key, IN_F, OUT_F)
    x = jax.random.normal(k_x, (B, IN_F), dtype=jnp.float32)
    y_ref = x @ (weight * adj.T).T + bias

    # f32 path (strict check) -- weight prepared once, layer called twice to
    # exercise the cached-weight / compiled-kernel reuse path.
    layer = SparseLinearPallas(weight, adj, bias)
    y = jax.block_until_ready(layer(x))
    y2 = jax.block_until_ready(layer(x))
    assert y.shape == (B, OUT_F)
    assert jnp.allclose(y, y_ref, atol=1e-5, rtol=1e-5), "mismatch vs reference"
    assert jnp.allclose(y2, y_ref, atol=1e-5, rtol=1e-5), "2nd-call mismatch"

    # Unaligned batch (exercises the pad + slice path).
    x3 = x[:3]
    y3 = jax.block_until_ready(layer(x3))
    assert y3.shape == (3, OUT_F)
    assert jnp.allclose(y3, y_ref[:3], atol=1e-5, rtol=1e-5), "padded-B mismatch"

    # bf16 MXU-operand path (f32 accumulation; quantizes both x and W).
    layer_bf16 = SparseLinearPallas(weight, adj, bias, compute_dtype=jnp.bfloat16)
    y_bf16 = jax.block_until_ready(layer_bf16(x))
    assert y_bf16.shape == (B, OUT_F)
    assert jnp.allclose(y_bf16, y_ref, atol=5e-2, rtol=5e-2), "bf16 path mismatch"

    # No-bias path (module supports bias=None).
    y_nb = jax.block_until_ready(sparse_linear(x, weight, adj, None))
    assert jnp.allclose(y_nb, x @ (weight * adj.T).T, atol=1e-5, rtol=1e-5)

    print("KERNEL_OK")
</pallas_src>

<mosaic_0001>
module attributes {stable_mosaic.version = 11 : i64} {
  func.func @_sl_kernel_acc_into_out(%arg0: i32, %arg1: i32, %arg2: i32, %arg3: memref<8x128xf32, #tpu.memory_space<vmem>>, %arg4: memref<128x128xf32, #tpu.memory_space<vmem>>, %arg5: memref<1x128xf32, #tpu.memory_space<vmem>>, %arg6: memref<8x128xf32, #tpu.memory_space<vmem>>) attributes {dimension_semantics = [#tpu.dimension_semantics<parallel>, #tpu.dimension_semantics<parallel>, #tpu.dimension_semantics<arbitrary>], iteration_bounds = array<i64: 1, 1, 1>, scalar_prefetch = 0 : i64, scratch_operands = 0 : i64, tpu.core_type = #tpu.core_type<tc>, window_params = [{transform_indices = @transform_0, window_bounds = array<i64: 8, 128>}, {transform_indices = @transform_1, window_bounds = array<i64: 128, 128>}, {transform_indices = @transform_2, window_bounds = array<i64: 1, 128>}, {transform_indices = @transform_3, window_bounds = array<i64: 8, 128>}]} {
    %c0_i32 = arith.constant 0 : i32
    %0 = arith.cmpi eq, %arg2, %c0_i32 : i32
    %1 = arith.extui %0 : i1 to i32
    %c0_i32_0 = arith.constant 0 : i32
    %2 = arith.cmpi ne, %1, %c0_i32_0 : i32
    scf.if %2 {
      %c0_8 = arith.constant 0 : index
      %c0_9 = arith.constant 0 : index
      %9 = vector.load %arg5[%c0_8, %c0_9] : memref<1x128xf32, #tpu.memory_space<vmem>>, vector<1x128xf32>
      %10 = vector.shape_cast %9 : vector<1x128xf32> to vector<1x128xf32>
      %11 = vector.broadcast %10 : vector<1x128xf32> to vector<8x128xf32>
      %c0_10 = arith.constant 0 : index
      %c0_11 = arith.constant 0 : index
      %12 = vector.load %arg6[%c0_10, %c0_11] : memref<8x128xf32, #tpu.memory_space<vmem>>, vector<8x128xf32>
      tpu.vector_store %arg6[%c0_10, %c0_11], %11 {strides = array<i32>} : memref<8x128xf32, #tpu.memory_space<vmem>>, vector<8x128xf32>,
    } else {
    }
    %c0 = arith.constant 0 : index
    %c0_1 = arith.constant 0 : index
    %3 = vector.load %arg6[%c0, %c0_1] : memref<8x128xf32, #tpu.memory_space<vmem>>, vector<8x128xf32>
    %c0_2 = arith.constant 0 : index
    %c0_3 = arith.constant 0 : index
    %4 = vector.load %arg3[%c0_2, %c0_3] : memref<8x128xf32, #tpu.memory_space<vmem>>, vector<8x128xf32>
    %c0_4 = arith.constant 0 : index
    %c0_5 = arith.constant 0 : index
    %5 = vector.load %arg4[%c0_4, %c0_5] : memref<128x128xf32, #tpu.memory_space<vmem>>, vector<128x128xf32>
    %cst = arith.constant dense<0.000000e+00> : vector<8x128xf32>
    %6 = tpu.matmul %4, %5, %cst {dimension_numbers = #tpu.dot_dimension_numbers<[1], [0], [0], [1], [0, 0, 1, 1], [], []>} : vector<8x128xf32>, vector<128x128xf32>, vector<8x128xf32> -> vector<8x128xf32>
    %7 = arith.addf %3, %6 : vector<8x128xf32>
    %c0_6 = arith.constant 0 : index
    %c0_7 = arith.constant 0 : index
    %8 = vector.load %arg6[%c0_6, %c0_7] : memref<8x128xf32, #tpu.memory_space<vmem>>, vector<8x128xf32>
    tpu.vector_store %arg6[%c0_6, %c0_7], %7 {strides = array<i32>} : memref<8x128xf32, #tpu.memory_space<vmem>>, vector<8x128xf32>,
    return
  }
  func.func @transform_0(%arg0: i32, %arg1: i32, %arg2: i32) -> (i32, i32) {
    %c0_i32 = arith.constant 0 : i32
    return %arg0, %arg2 : i32, i32
  }
  func.func @transform_1(%arg0: i32, %arg1: i32, %arg2: i32) -> (i32, i32) {
    %c0_i32 = arith.constant 0 : i32
    return %arg2, %arg1 : i32, i32
  }
  func.func @transform_2(%arg0: i32, %arg1: i32, %arg2: i32) -> (i32, i32) {
    %c0_i32 = arith.constant 0 : i32
    %c0_i32_0 = arith.constant 0 : i32
    return %c0_i32, %arg1 : i32, i32
  }
  func.func @transform_3(%arg0: i32, %arg1: i32, %arg2: i32) -> (i32, i32) {
    %c0_i32 = arith.constant 0 : i32
    return %arg0, %arg1 : i32, i32
  }
}

</mosaic_0001>

<bundles_post_ra>
// kernel: _sparse_linear_matmul.1
= control target key start
LH: loop header
LB: loop body
LE: loop exit
PB: predicated region body
PF: predicated region fallthrough
CT: control target
= control target key end

     0   :  { %8 = vsyncpa [#allocation3], 0  ;;  %s233_s0 = inlined_call_operand.hbm [shape: f32[8,128], index: 0, kind: input, shape index: {}]   ;;  %s234_s1 = inlined_call_operand.hbm [shape: f32[128,128], index: 1, kind: input, shape index: {}]   ;;  %s235_s2 = inlined_call_operand.vmem [shape: f32[1,128], index: 2, kind: input, shape index: {}]   ;;  %s236_s3 = inlined_call_operand.hbm [shape: f32[8,128], index: 3, kind: output, shape index: {}]  }
   0x1   :  { %9 = vsyncpa [#allocation6], 0 }
   0x2   :  { %10 = vsyncpa [#allocation4], 0  ;;  %s16_s14 = sshll.u32 %s233_s0, 4  ;;  %s196_s15 = smov [#allocation2]   ;;  %s17_s14 = int_to_ptr.hbm [resolvable:$true] %s16_s14 }
   0x3   :  { %s18_s16 = sshll.u32 %s196_s15, 4  ;;  %s26_s19 = sshll.u32 %s234_s1, 4  ;;  %s19_s16 = int_to_ptr.vmem [resolvable:$true] %s18_s16  ;;  %s27_s19 = int_to_ptr.hbm [resolvable:$true] %s26_s19 }
   0x4   :  { %21 = dma.hbm_to_vmem [thread:$0]  %s17_s14, 128, %s19_s16, [#allocation3]  }
   0x5   :  { %s197_s20 = smov [#allocation5]   ;;  %s198_s22 = smov 128  }
   0x6   :  { %s28_s21 = sshll.u32 %s197_s20, 4  ;;  %s199_s23 = smov 8   ;;  %s29_s21 = int_to_ptr.vmem [resolvable:$true] %s28_s21 }
   0x7   :  { %34 = dma.hbm_to_vmem [thread:$0]  %s27_s19, 2048, %s29_s21, [#allocation6], %s198_s22, %s198_s22, %s199_s23  }
   0x8   :  { %190 = dma.done.wait [#allocation3], 128  }
   0x9   :  { %191 = vsyncadd [#allocation3], 4294967168 }
   0xa   :  { %192 = dma.done.wait [#allocation6], 2048  }
   0xb   :  { %193 = vsyncadd [#allocation6], 4294965248  ;;  %v71_v0 = vld [vmem:[#allocation5 + $0x78] sm:$0xff]  ;;  %v70_v1 = vld [vmem:[#allocation5 + $0x70] sm:$0xff]  ;;  %s200_s24 = smov [#allocation7]   ;;  %s101_s28 = sshll.u32 %s236_s3, 4  ;;  %s102_s28 = int_to_ptr.hbm [resolvable:$true] %s101_s28 }
   0xc   :  { %72 = vmatpush.msra.mxu0 %v71_v0  ;;  %v69_v2 = vld [vmem:[#allocation5 + $0x68] sm:$0xff]  ;;  %v68_v3 = vld [vmem:[#allocation5 + $0x60] sm:$0xff]  ;;  %v67_v4 = vld [vmem:[#allocation5 + $0x58] sm:$0xff]  ;;  %s99_s25 = sshll.u32 %s200_s24, 4  ;;  %s100_s25 = int_to_ptr.vmem [resolvable:$true] %s99_s25 }
   0xd   :  { %v66_v5 = vld [vmem:[#allocation5 + $0x50] sm:$0xff]  ;;  %v65_v6 = vld [vmem:[#allocation5 + $0x48] sm:$0xff]  ;;  %v64_v7 = vld [vmem:[#allocation5 + $0x40] sm:$0xff] }
   0xe   :  { %73 = vmatpush.msra.mxu0 %v70_v1  ;;  %v63_v8 = vld [vmem:[#allocation5 + $0x38] sm:$0xff]  ;;  %v62_v9 = vld [vmem:[#allocation5 + $0x30] sm:$0xff]  ;;  %v61_v10 = vld [vmem:[#allocation5 + $0x28] sm:$0xff] }
   0xf   :  { %v60_v11 = vld [vmem:[#allocation5 + $0x20] sm:$0xff]  ;;  %v59_v12 = vld [vmem:[#allocation5 + $0x18] sm:$0xff]  ;;  %v58_v13 = vld [vmem:[#allocation5 + $0x10] sm:$0xff] }
  0x10   :  { %74 = vmatpush.msra.mxu0 %v69_v2  ;;  %v57_v14 = vld [vmem:[#allocation5 + $0x8] sm:$0xff]  ;;  %v56_v15 = vld [vmem:[#allocation5] sm:$0xff]  ;;  %v55_v16 = vld [vmem:[#allocation2] sm:$0xff] }
  0x11   :  { %v117_v17 = vld [vmem:[%s235_s2] ss:$0 sm:$0xff] }
  0x12   :  { %75 = vmatpush.msra.mxu0 %v68_v3 }
  0x14   :  { %76 = vmatpush.msra.mxu0 %v67_v4 }
  0x16   :  { %77 = vmatpush.msra.mxu0 %v66_v5 }
  0x18   :  { %78 = vmatpush.msra.mxu0 %v65_v6 }
  0x1a   :  { %79 = vmatpush.msra.mxu0 %v64_v7 }
  0x1c   :  { %80 = vmatpush.msra.mxu0 %v63_v8 }
  0x1e   :  { %81 = vmatpush.msra.mxu0 %v62_v9 }
  0x20   :  { %82 = vmatpush.msra.mxu0 %v61_v10 }
  0x22   :  { %83 = vmatpush.msra.mxu0 %v60_v11 }
  0x24   :  { %84 = vmatpush.msra.mxu0 %v59_v12 }
  0x26   :  { %85 = vmatpush.msra.mxu0 %v58_v13 }
  0x28   :  { %86 = vmatpush.msra.mxu0 %v57_v14 }
  0x2a   :  { %87 = vmatpush.msra.mxu0 %v56_v15 }
  0x2b   :  { %88 = vmatmul.f32.vlgmr.msra.gmra.mxu0 %v55_v16 }
  0xa8   :  { %v89_v18 = vpop.f32.mrf.mxu0 }
  0xa9   :  { %v92_v19 = vadd.f32 %v117_v17, %v89_v18 }
  0xab   :  { %93 = vst [vmem:[#allocation7] sm:$0xff] %v92_v19 }
  0xac   :  { %104 = dma.vmem_to_hbm [thread:$0]  %s100_s25, 128, %s102_s28, [#allocation4]  }
  0xad   :  { %194 = dma.done.wait [#allocation4], 128  }
  0xae   :  { %195 = vsyncadd [#allocation4], 4294967168 }
  0xaf   :  { %109 = vsyncpa [#allocation3], 1 }
  0xb0   :  { %110 = vsyncpa [#allocation6], 1 }
  0xb1   :  { %111 = vsyncpa [#allocation4], 1 }

</bundles_post_ra>
